<compile_context>
chip_gen: v7x
topology: tpu7x:2x2x1
jax: 0.10.0
libtpu: 0.0.40
codegen_flags: <defaults>
</compile_context>

<pallas_src>
import functools

import jax
import jax.numpy as jnp
from jax.experimental import pallas as pl
from jax.experimental.pallas import tpu as pltpu

NF_PAD = 1024            # backbone feature width padded 1000 -> 1024
NF_HALF = NF_PAD // 2    # per-TensorCore half (lane dense, 4 x 128)
H_PAD = 128              # hidden width padded 64 -> 128 (lane dense)


def _round_up(x, m):
    return (x + m - 1) // m * m


# ---------------------------------------------------------------------------
# Kernel A: weight-streaming backbone matmul, split over NF halves.
#   grid = (2, n_k): axis 0 "parallel" (one NF half per TensorCore on v7x),
#   axis 1 "arbitrary" (K reduction into an f32 VMEM accumulator).
#   The k==last epilogue folds relu + the w0-half matmul so only a [B, H_PAD]
#   partial per half leaves the kernel.
# ---------------------------------------------------------------------------
def _backbone_kernel(img_ref,     # [B, Kp]              bf16 (resident, const)
                     wp_ref,      # [1, tk, NF_HALF]     bf16 (streamed K-tile)
                     bp_ref,      # [1, 1, NF_HALF]      f32
                     w0_ref,      # [1, NF_HALF, H_PAD]  f32
                     part_ref,    # [1, B, H_PAD]        f32 (out: partial x)
                     feat_acc,    # VMEM [B, NF_HALF]    f32 scratch
                     *, tk):
    k = pl.program_id(1)

    @pl.when(k == 0)
    def _():
        # fold the backbone-bias half into the accumulator init
        feat_acc[...] = jnp.broadcast_to(bp_ref[0], feat_acc.shape)

    off = pl.multiple_of(k * tk, 128)
    feat_acc[...] += jnp.dot(img_ref[:, pl.ds(off, tk)], wp_ref[0],
                             preferred_element_type=jnp.float32)

    @pl.when(k == pl.num_programs(1) - 1)
    def _():
        x_half = jnp.maximum(feat_acc[...], 0.0)          # relu on this half
        part_ref[0] = jnp.dot(x_half, w0_ref[0],
                              preferred_element_type=jnp.float32)


# ---------------------------------------------------------------------------
# Kernel B: tiny head.  Sums the two partial-x contributions, adds b0, and runs
# relu / gene branch / concat-l3 / tanh.  Single invocation, all operands fit
# trivially in VMEM.
# ---------------------------------------------------------------------------
def _head_kernel(part_ref,   # [2, B, H_PAD] f32
                 gene_ref,   # [B, G]        f32
                 b0_ref, w1_ref, b1_ref, w2_ref, b2_ref,
                 w3x_ref, w3y_ref, b3_ref,
                 out_ref):   # [B, 1]        f32
    def elu(v):
        return jnp.where(v > 0, v, jnp.expm1(v))

    # ---- x branch: relu(feat) -> l0 -> relu (w0 already applied per half) ----
    x = jnp.maximum(part_ref[0] + part_ref[1] + b0_ref[...], 0.0)

    # ---- y branch: l1 -> elu -> l2 -> elu ----
    y = jnp.dot(gene_ref[...], w1_ref[...],
                preferred_element_type=jnp.float32) + b1_ref[...]
    y = elu(y)
    y = jnp.dot(y, w2_ref[...],
                preferred_element_type=jnp.float32) + b2_ref[...]
    y = elu(y)

    # ---- z = tanh(l3(cat(x, y)))  (split-weight concat trick, exact) ----
    z = (jnp.dot(x, w3x_ref[...], preferred_element_type=jnp.float32)
         + jnp.dot(y, w3y_ref[...], preferred_element_type=jnp.float32)
         + b3_ref[...])
    out_ref[...] = jnp.tanh(z).astype(out_ref.dtype)


# ---------------------------------------------------------------------------
# One-time parameter prep (hoisted out of the per-call path).
# ---------------------------------------------------------------------------
def prepare_params(params, *, tk_max=8192):
    """Pad / cast / split the model parameters once.  The padded bf16 wp copy
    was previously rebuilt every call and dominated HBM traffic."""
    f32, bf16 = jnp.float32, jnp.bfloat16

    wp, bp = params["wp"], params["bp"]     # [K, 1000], [1, 1000]
    w0, b0 = params["w0"], params["b0"]     # [1000, 64], [1, 64]
    w1, b1 = params["w1"], params["b1"]     # [G, 64],    [1, 64]
    w2, b2 = params["w2"], params["b2"]     # [64, 64],   [1, 64]
    w3, b3 = params["w3"], params["b3"]     # [128, 1],   [1, 1]

    K, NF0 = wp.shape
    H0 = w0.shape[1]
    G = w1.shape[0]

    # ---- K tile: lane-dense multiple of 128 ----
    tk_max = _round_up(max(int(tk_max), 128), 128)
    Kp = _round_up(K, 128)
    if Kp <= tk_max:
        tk = Kp
    else:
        tk = tk_max
        Kp = _round_up(K, tk)
    n_k = Kp // tk

    # ---- pad to lane-dense shapes (exact: padded lanes stay zero) ----
    wp_p = jnp.zeros((Kp, NF_PAD), bf16).at[:K, :NF0].set(wp.astype(bf16))
    bp_p = jnp.zeros((1, NF_PAD), f32).at[:, :NF0].set(bp.astype(f32))
    w0_p = jnp.zeros((NF_PAD, H_PAD), f32).at[:NF0, :H0].set(w0.astype(f32))

    # ---- split NF into 2 contiguous halves (one per TensorCore on v7x) ----
    wp3 = jnp.stack([wp_p[:, :NF_HALF], wp_p[:, NF_HALF:]], axis=0)   # [2, Kp, 512]
    bp3 = bp_p.reshape(2, 1, NF_HALF)                                 # [2, 1, 512]
    w03 = jnp.stack([w0_p[:NF_HALF], w0_p[NF_HALF:]], axis=0)         # [2, 512, 128]

    arrays = dict(
        wp3=wp3, bp3=bp3, w03=w03,
        b0=jnp.zeros((1, H_PAD), f32).at[:, :H0].set(b0.astype(f32)),
        w1=jnp.zeros((G, H_PAD), f32).at[:, :H0].set(w1.astype(f32)),
        b1=jnp.zeros((1, H_PAD), f32).at[:, :H0].set(b1.astype(f32)),
        w2=jnp.zeros((H_PAD, H_PAD), f32).at[:H0, :H0].set(w2.astype(f32)),
        b2=jnp.zeros((1, H_PAD), f32).at[:, :H0].set(b2.astype(f32)),
        w3x=jnp.zeros((H_PAD, 1), f32).at[:H0, :].set(w3[:H0, :].astype(f32)),
        w3y=jnp.zeros((H_PAD, 1), f32).at[:H0, :].set(w3[H0:, :].astype(f32)),
        b3=b3.astype(f32).reshape(1, 1),
    )
    arrays = jax.tree_util.tree_map(jax.block_until_ready, arrays)
    meta = dict(K=K, Kp=Kp, tk=tk, n_k=n_k, G=G)
    return arrays, meta


def classifier_forward(img_nchw, gene_muts, prepped):
    """Per-call path: flatten/pad/cast the (small) image, then two Pallas calls."""
    arrays, meta = prepped
    f32, bf16 = jnp.float32, jnp.bfloat16
    B = img_nchw.shape[0]
    K, Kp, tk, n_k = meta["K"], meta["Kp"], meta["tk"], meta["n_k"]

    img_flat = img_nchw.reshape(B, -1).astype(bf16)
    assert img_flat.shape[1] == K, "image pixel count does not match prepared wp"
    img_p = jnp.zeros((B, Kp), bf16).at[:, :K].set(img_flat)
    gene = gene_muts.astype(f32)

    # VMEM budget: double-buffered wp half-blocks + resident img + constants
    # + the f32 accumulator.  2x headroom, clamped to [32 MiB, 96 MiB].
    vmem_need = (2 * tk * NF_HALF * 2                       # wp (bf16, 2 bufs)
                 + 2 * B * Kp * 2                           # img (bf16, 2 bufs)
                 + 2 * (NF_HALF * H_PAD + NF_HALF + B * H_PAD) * 4   # consts/out
                 + B * NF_HALF * 4)                         # feat accumulator
    vmem_limit = int(min(max(2 * vmem_need, 32 << 20), 96 << 20))

    # ---- Kernel A: stream wp halves, accumulate feat, emit l0 partials ----
    partial = pl.pallas_call(
        functools.partial(_backbone_kernel, tk=tk),
        out_shape=jax.ShapeDtypeStruct((2, B, H_PAD), f32),
        grid_spec=pltpu.PrefetchScalarGridSpec(
            num_scalar_prefetch=0,
            grid=(2, n_k),
            in_specs=[
                pl.BlockSpec((B, Kp), lambda h, k: (0, 0)),               # img (resident)
                pl.BlockSpec((1, tk, NF_HALF), lambda h, k: (h, k, 0)),   # wp (streamed)
                pl.BlockSpec((1, 1, NF_HALF), lambda h, k: (h, 0, 0)),    # bp half
                pl.BlockSpec((1, NF_HALF, H_PAD), lambda h, k: (h, 0, 0)),  # w0 half
            ],
            out_specs=pl.BlockSpec((1, B, H_PAD), lambda h, k: (h, 0, 0)),
            scratch_shapes=[pltpu.VMEM((B, NF_HALF), f32)],
        ),
        compiler_params=pltpu.CompilerParams(
            dimension_semantics=("parallel", "arbitrary"),
            vmem_limit_bytes=vmem_limit),
    )(img_p, arrays["wp3"], arrays["bp3"], arrays["w03"])

    # ---- Kernel B: tiny head (sum partials + gene branch + concat-l3 + tanh) ----
    out = pl.pallas_call(
        _head_kernel,
        out_shape=jax.ShapeDtypeStruct((B, 1), f32),
    )(partial, gene, arrays["b0"], arrays["w1"], arrays["b1"],
      arrays["w2"], arrays["b2"], arrays["w3x"], arrays["w3y"], arrays["b3"])
    return out


def init_params(key, in_pixels, numgenes, backbone_features=1000, hidden=64):
    """Deterministic PyTorch-style uniform(+-1/sqrt(fan_in)) init.
    Weights are stored as [in, out] (transposed vs. nn.Linear) for y = x @ W + b."""
    def linear(k, fan_in, fan_out):
        kw, kb = jax.random.split(k)
        bound = 1.0 / jnp.sqrt(jnp.float32(fan_in))
        w = jax.random.uniform(kw, (fan_in, fan_out), jnp.float32, -bound, bound)
        b = jax.random.uniform(kb, (1, fan_out), jnp.float32, -bound, bound)
        return w, b

    keys = jax.random.split(key, 5)
    wp, bp = linear(keys[0], in_pixels, backbone_features)   # backbone stand-in
    w0, b0 = linear(keys[1], backbone_features, hidden)      # l0
    w1, b1 = linear(keys[2], numgenes, hidden)               # l1
    w2, b2 = linear(keys[3], hidden, hidden)                 # l2
    w3, b3 = linear(keys[4], 2 * hidden, 1)                  # l3 (input = cat(x, y))
    return {"wp": wp, "bp": bp, "w0": w0, "b0": b0, "w1": w1, "b1": b1,
            "w2": w2, "b2": b2, "w3": w3, "b3": b3}


def classifier_reference(img_nchw, gene_muts, params):
    """Pure-JAX f32 reference of the same forward pass."""
    B = img_nchw.shape[0]
    img = img_nchw.reshape(B, -1).astype(jnp.float32)
    gene = gene_muts.astype(jnp.float32)
    elu = lambda v: jnp.where(v > 0, v, jnp.expm1(v))
    feat = img @ params["wp"] + params["bp"]
    x = jnp.maximum(feat, 0.0)
    x = jnp.maximum(x @ params["w0"] + params["b0"], 0.0)
    y = elu(gene @ params["w1"] + params["b1"])
    y = elu(y @ params["w2"] + params["b2"])
    z = jnp.concatenate([x, y], axis=1) @ params["w3"] + params["b3"]
    return jnp.tanh(z)


if __name__ == "__main__":
    B, C, H, W = 2, 3, 16, 16
    NUMGENES = 32

    key = jax.random.PRNGKey(0)
    k_img, k_gene, k_par = jax.random.split(key, 3)

    img = jax.random.normal(k_img, (B, C, H, W), jnp.float32)       # NCHW
    gene_muts = jax.random.normal(k_gene, (B, NUMGENES), jnp.float32)
    params = init_params(k_par, in_pixels=C * H * W, numgenes=NUMGENES)

    # one-time prep (hoisted pad/cast/split); small tk (256) so the multi-step
    # K-reduction pipeline and the 2-half parallel axis are both exercised
    prepped = prepare_params(params, tk_max=256)

    out = classifier_forward(img, gene_muts, prepped)
    out = jax.block_until_ready(out)

    ref = classifier_reference(img, gene_muts, params)
    assert out.shape == (B, 1) and out.dtype == jnp.float32
    assert jnp.allclose(out, ref, atol=2e-2, rtol=2e-2), (out, ref)
    print("KERNEL_OK")
</pallas_src>

<mosaic_0001>
module attributes {stable_mosaic.version = 11 : i64} {
  func.func @_backbone_kernel(%arg0: i32, %arg1: i32, %arg2: memref<2x768xbf16, #tpu.memory_space<vmem>>, %arg3: memref<1x256x512xbf16, #tpu.memory_space<vmem>>, %arg4: memref<1x1x512xf32, #tpu.memory_space<vmem>>, %arg5: memref<1x512x128xf32, #tpu.memory_space<vmem>>, %arg6: memref<1x2x128xf32, #tpu.memory_space<vmem>>, %arg7: memref<2x512xf32, #tpu.memory_space<vmem>>) attributes {dimension_semantics = [#tpu.dimension_semantics<parallel>, #tpu.dimension_semantics<arbitrary>], iteration_bounds = array<i64: 2, 3>, scalar_prefetch = 0 : i64, scratch_operands = 1 : i64, tpu.core_type = #tpu.core_type<tc>, window_params = [{pipeline_mode = #tpu.pipeline_mode<synchronous>, transform_indices = @transform_0, window_bounds = array<i64: 2, 768>}, {transform_indices = @transform_1, window_bounds = array<i64: 1, 256, 512>}, {transform_indices = @transform_2, window_bounds = array<i64: 1, 1, 512>}, {transform_indices = @transform_3, window_bounds = array<i64: 1, 512, 128>}, {transform_indices = @transform_4, window_bounds = array<i64: 1, 2, 128>}]} {
    %c0_i32 = arith.constant 0 : i32
    %0 = arith.cmpi eq, %arg1, %c0_i32 : i32
    %1 = arith.extui %0 : i1 to i32
    %c0_i32_0 = arith.constant 0 : i32
    %2 = arith.cmpi ne, %1, %c0_i32_0 : i32
    scf.if %2 {
      %c0_9 = arith.constant 0 : index
      %c0_10 = arith.constant 0 : index
      %c0_11 = arith.constant 0 : index
      %16 = vector.load %arg4[%c0_9, %c0_10, %c0_11] : memref<1x1x512xf32, #tpu.memory_space<vmem>>, vector<1x1x512xf32>
      %17 = vector.shape_cast %16 : vector<1x1x512xf32> to vector<1x512xf32>
      %18 = vector.shape_cast %17 : vector<1x512xf32> to vector<1x512xf32>
      %19 = vector.broadcast %18 : vector<1x512xf32> to vector<2x512xf32>
      %c0_12 = arith.constant 0 : index
      %c0_13 = arith.constant 0 : index
      %20 = vector.load %arg7[%c0_12, %c0_13] : memref<2x512xf32, #tpu.memory_space<vmem>>, vector<2x512xf32>
      tpu.vector_store %arg7[%c0_12, %c0_13], %19 {strides = array<i32>} : memref<2x512xf32, #tpu.memory_space<vmem>>, vector<2x512xf32>,
    } else {
    }
    %c256_i32 = arith.constant 256 : i32
    %3 = arith.muli %arg1, %c256_i32 : i32
    %4 = tpu.assume_multiple %3, 128 : i32
    %c0 = arith.constant 0 : index
    %c0_1 = arith.constant 0 : index
    %5 = vector.load %arg7[%c0, %c0_1] : memref<2x512xf32, #tpu.memory_space<vmem>>, vector<2x512xf32>
    %c0_2 = arith.constant 0 : index
    %6 = arith.index_cast %4 : i32 to index
    %7 = vector.load %arg2[%c0_2, %6] : memref<2x768xbf16, #tpu.memory_space<vmem>>, vector<2x256xbf16>
    %c0_3 = arith.constant 0 : index
    %c0_4 = arith.constant 0 : index
    %c0_5 = arith.constant 0 : index
    %8 = vector.load %arg3[%c0_3, %c0_4, %c0_5] : memref<1x256x512xbf16, #tpu.memory_space<vmem>>, vector<1x256x512xbf16>
    %9 = vector.shape_cast %8 : vector<1x256x512xbf16> to vector<256x512xbf16>
    %cst = arith.constant dense<0.000000e+00> : vector<2x512xf32>
    %10 = tpu.matmul %7, %9, %cst {dimension_numbers = #tpu.dot_dimension_numbers<[1], [0], [0], [1], [0, 0, 1, 1], [], []>} : vector<2x256xbf16>, vector<256x512xbf16>, vector<2x512xf32> -> vector<2x512xf32>
    %11 = arith.addf %5, %10 : vector<2x512xf32>
    %c0_6 = arith.constant 0 : index
    %c0_7 = arith.constant 0 : index
    %12 = vector.load %arg7[%c0_6, %c0_7] : memref<2x512xf32, #tpu.memory_space<vmem>>, vector<2x512xf32>
    tpu.vector_store %arg7[%c0_6, %c0_7], %11 {strides = array<i32>} : memref<2x512xf32, #tpu.memory_space<vmem>>, vector<2x512xf32>,
    %c2_i32 = arith.constant 2 : i32
    %13 = arith.cmpi eq, %arg1, %c2_i32 : i32
    %14 = arith.extui %13 : i1 to i32
    %c0_i32_8 = arith.constant 0 : i32
    %15 = arith.cmpi ne, %14, %c0_i32_8 : i32
    scf.if %15 {
      %c0_9 = arith.constant 0 : index
      %c0_10 = arith.constant 0 : index
      %16 = vector.load %arg7[%c0_9, %c0_10] : memref<2x512xf32, #tpu.memory_space<vmem>>, vector<2x512xf32>
      %cst_11 = arith.constant 0.000000e+00 : f32
      %17 = vector.broadcast %cst_11 : f32 to vector<2x512xf32>
      %18 = arith.maximumf %16, %17 : vector<2x512xf32>
      %c0_12 = arith.constant 0 : index
      %c0_13 = arith.constant 0 : index
      %c0_14 = arith.constant 0 : index
      %19 = vector.load %arg5[%c0_12, %c0_13, %c0_14] : memref<1x512x128xf32, #tpu.memory_space<vmem>>, vector<1x512x128xf32>
      %20 = vector.shape_cast %19 : vector<1x512x128xf32> to vector<512x128xf32>
      %cst_15 = arith.constant dense<0.000000e+00> : vector<2x128xf32>
      %21 = tpu.matmul %18, %20, %cst_15 {dimension_numbers = #tpu.dot_dimension_numbers<[1], [0], [0], [1], [0, 0, 1, 1], [], []>} : vector<2x512xf32>, vector<512x128xf32>, vector<2x128xf32> -> vector<2x128xf32>
      %c0_16 = arith.constant 0 : index
      %c0_17 = arith.constant 0 : index
      %c0_18 = arith.constant 0 : index
      %22 = vector.load %arg6[%c0_16, %c0_17, %c0_18] : memref<1x2x128xf32, #tpu.memory_space<vmem>>, vector<1x2x128xf32>
      %23 = vector.shape_cast %22 : vector<1x2x128xf32> to vector<2x128xf32>
      %24 = vector.shape_cast %21 : vector<2x128xf32> to vector<1x2x128xf32>
      tpu.vector_store %arg6[%c0_16, %c0_17, %c0_18], %24 {strides = array<i32>} : memref<1x2x128xf32, #tpu.memory_space<vmem>>, vector<1x2x128xf32>,
    } else {
    }
    return
  }
  func.func @transform_0(%arg0: i32, %arg1: i32) -> (i32, i32) {
    %c0_i32 = arith.constant 0 : i32
    %c0_i32_0 = arith.constant 0 : i32
    %c0_i32_1 = arith.constant 0 : i32
    return %c0_i32, %c0_i32_0 : i32, i32
  }
  func.func @transform_1(%arg0: i32, %arg1: i32) -> (i32, i32, i32) {
    %c0_i32 = arith.constant 0 : i32
    %c0_i32_0 = arith.constant 0 : i32
    return %arg0, %arg1, %c0_i32 : i32, i32, i32
  }
  func.func @transform_2(%arg0: i32, %arg1: i32) -> (i32, i32, i32) {
    %c0_i32 = arith.constant 0 : i32
    %c0_i32_0 = arith.constant 0 : i32
    %c0_i32_1 = arith.constant 0 : i32
    return %arg0, %c0_i32, %c0_i32_0 : i32, i32, i32
  }
  func.func @transform_3(%arg0: i32, %arg1: i32) -> (i32, i32, i32) {
    %c0_i32 = arith.constant 0 : i32
    %c0_i32_0 = arith.constant 0 : i32
    %c0_i32_1 = arith.constant 0 : i32
    return %arg0, %c0_i32, %c0_i32_0 : i32, i32, i32
  }
  func.func @transform_4(%arg0: i32, %arg1: i32) -> (i32, i32, i32) {
    %c0_i32 = arith.constant 0 : i32
    %c0_i32_0 = arith.constant 0 : i32
    %c0_i32_1 = arith.constant 0 : i32
    return %arg0, %c0_i32, %c0_i32_0 : i32, i32, i32
  }
}

</mosaic_0001>

<bundles_post_ra>
// kernel: tpu_custom_call.1
= control target key start
LH: loop header
LB: loop body
LE: loop exit
PB: predicated region body
PF: predicated region fallthrough
CT: control target
= control target key end

     0   :  { %s2552_s0 = inlined_call_operand.hbm [shape: bf16[2,768], index: 0, kind: input, shape index: {}]   ;;  %s2553_s1 = inlined_call_operand.hbm [shape: bf16[2,768,512], index: 1, kind: input, shape index: {}]   ;;  %s2554_s2 = inlined_call_operand.hbm [shape: f32[2,1,512], index: 2, kind: input, shape index: {}]   ;;  %s2555_s3 = inlined_call_operand.hbm [shape: f32[2,512,128], index: 3, kind: input, shape index: {}]   ;;  %s2556_s4 = inlined_call_operand.hbm [shape: f32[2,2,128], index: 4, kind: output, shape index: {}]  }
   0x1   :  { %2571 = sst [smem:[#allocation26_spill]] %s2553_s1 }
   0x2   :  { %2572 = sst [smem:[#allocation27_spill]] %s2556_s4 }
   0x3   :  { %9 = vsyncpa [#allocation4], 0 }
   0x4   :  { %10 = vsyncpa [#allocation7], 0 }
   0x5   :  { %12 = vsyncpa [#allocation7 + $0x1], 0 }
   0x6   :  { %13 = vsyncpa [#allocation10], 0 }
   0x7   :  { %15 = vsyncpa [#allocation10 + $0x1], 0 }
   0x8   :  { %16 = vsyncpa [#allocation5], 0 }
   0x9   :  { %18 = vsyncpa [#allocation5 + $0x1], 0  ;;  %s2019_s15 = smov 0   ;;  %s2021_s16 = smov 0  }
   0xa   :  { %s2023_s17 = smov 0   ;;  %s2025_s18 = smov 0  }
   0xb   :  { %s2027_s19 = smov 0   ;;  %s2029_s20 = smov 0  }
   0xc   :  { %s2031_s21 = smov 0   ;;  %s2033_s22 = smov 0  }
   0xd   :  { %s2035_s23 = smov 0   ;;  %s2037_s24 = smov 0  }
   0xe   :  { %s2039_s25 = smov 0  }
   0xf LB: > { %2573 = sst [smem:[#allocation17_spill]] %s1948_s17  ;;  %s33_s26 = sadd.s32 1, %s1972_s23  ;;  %s1980_s25 = sphi %s2039_s25, %s24_s25   ;;  %s1976_s24 = sphi %s2037_s24, %s2620_s24   ;;  %s1972_s23 = sphi %s2035_s23, %s2619_s23   ;;  %s1968_s22 = sphi %s2033_s22, %s2618_s22   ;;  %s1964_s21 = sphi %s2031_s21, %s2611_s21   ;;  %s1960_s20 = sphi %s2029_s20, %s2610_s20   ;;  %s1956_s19 = sphi %s2027_s19, %s2617_s19   ;;  %s1952_s18 = sphi %s2025_s18, %s2616_s18   ;;  %s1948_s17 = sphi %s2023_s17, %s2608_s17   ;;  %s1944_s16 = sphi %s2021_s16, %s2615_s16   ;;  %s1940_s15 = sphi %s2019_s15, %s2614_s15  }
  0x10   : > { %2574 = sst [smem:[#allocation18_spill]] %s1960_s20  ;;  %s36_s27 = sadd.s32 1, %s1976_s24 }
  0x11   : > { %2575 = sst [smem:[#allocation19_spill]] %s1964_s21  ;;  %p34_p0 = scmp.ge.s32.totalorder %s33_s26, 3 }
  0x12   : > { %2576 = sst [smem:[#allocation20_spill]] %s1968_s22  ;;  %s66_s28 = sadd.s32 1, %s1960_s20 }
  0x13   : > { %2577 = sst [smem:[#allocation21_spill]] %s1972_s23  ;;  %p73_p1 = scmp.ne.s32.totalorder %s1960_s20, %s1956_s19 }
  0x14   : > { %p2562_p2 = scmp.eq.s32.totalorder %s1980_s25, 0  ;;  %s2622_s26 = smov (%p34_p0, %s33_s26), 0 }
  0x15   : > { %2578 = sst [smem:[#allocation22_spill]] %s2622_s26  ;;  %s2624_s27 = smov (!%p34_p0, %s36_s27), %s1976_s24 }
  0x16   : > { %s62_s29 = ssub.s32 %s1972_s23, %s2622_s26  ;;  %p2087_p3 = por %p2562_p2, %p73_p1 }
  0x17   : > { %p38_p4 = scmp.ge.s32.totalorder %s2624_s27, 2  ;;  %p2561_p5 = scmp.lt.s32.totalorder %s1980_s25, 6 }
  0x18   : > { %s192_s5 = sand.u32 1, %s1980_s25   ;;  %s194_s6 = sand.u32 1, %s1960_s20  }
  0x19   : > { %s2626_s27 = smov (%p38_p4, %s2624_s27), 0  ;;  %s1276_s8 = sshll.u32 %s194_s6, 9 }
  0x1a   : > { %2580 = sst [smem:[#allocation23_spill]] %s2626_s27  ;;  %s2098_s7 = ssub.s32 %s1976_s24, %s2626_s27 }
  0x1b   : > { %s63_s9 = sor.u32 %s62_s29, %s2098_s7  ;;  %p90_p6 = scmp.eq.s32.totalorder %s2098_s7, 0 }
  0x1c   : > { %p64_p7 = scmp.eq.s32.totalorder %s63_s9, 0  ;;  %s1364_s10 = sshll.u32 %s1972_s23, 7 }
  0x1d   : > { %s1501_s11 = smul.u32 384, %s1976_s24  ;;  %s196_s14 = scalar_lea.vmem [#allocation6], %s1276_s8 }
  0x1e   : > { %s2105_s12 = scalar_select %p64_p7, %s1960_s20, %s66_s28  }
  0x1f   : > { %s203_s13 = sadd.s32 %s1501_s11, %s1364_s10  ;;  %s206_s26 = sshll.u32 %s196_s14, 4  ;;  %s2107_s26 = int_to_ptr.vmem [resolvable:$true] %s206_s26 }
  0x20   : > { %2581 = sst [smem:[#allocation24_spill]] %s2105_s12  ;;  %s1279_s4 = sshll.u32 %s203_s13, 6 }
  0x21   : > { %s2582_s1 = sld [smem:[#allocation26_spill]]  ;;  %p2118_p8 = pnand %p2561_p5, %p2087_p3 }
  0x22   : > { %s2122_s29 = scalar_lea.sflag [#allocation7], %s192_s5 }
  0x23   : > { %p1730_p10 = pneg %p2118_p8 }
  0x27   : > { %s2112_s27 = scalar_lea.hbm %s2582_s1, %s1279_s4  ;;  %s1733_s22 = scalar_lea.hbm %s2582_s1, 49152 }
  0x28   : > { %s1728_s6 = scalar_lea.hbm %s2112_s27, 8192  ;;  %p1734_p13 = scmp.lt.u32.totalorder %s2112_s27, %s2582_s1 }
  0x29   : > { %p1729_p9 = scmp.ne.s32.totalorder %s2112_s27, %s1728_s6  ;;  %p1735_p0 = scmp.lt.u32.totalorder %s1733_s22, %s1728_s6 }
  0x2a   : > { %p1737_p3 = scmp.lt.u32.totalorder %s1728_s6, %s2112_s27 }
  0x2b   : > { %p1731_p11 = pnand %p1730_p10, %p1729_p9  ;;  %p1736_p1 = por %p1735_p0, %p1734_p13 }
  0x2d   : > { %p1732_p12 = pneg %p1731_p11  ;;  %p1738_p4 = por %p1737_p3, %p1736_p1 }
  0x2f   : > { %p1739_p7 = pnand %p1738_p4, %p1732_p12 }
  0x31   : > { %1742 = shalt.err (!%p1739_p7)
}
  0x32   : > { %s1743_s5 = scalar_lea.vmem %s2107_s26, 8192  ;;  %s1982_s9 = smov [#allocation6]  }
  0x33   : > { %p1744_p9 = scmp.ne.s32.totalorder %s2107_s26, %s1743_s5  ;;  %s1748_s10 = sshll.u32 %s1982_s9, 4  ;;  %s1749_s10 = int_to_ptr.vmem [resolvable:$false] %s1748_s10 }
  0x34   : > { %s1750_s11 = scalar_lea.vmem %s1749_s10, 16384  ;;  %p1751_p2 = scmp.lt.s32.totalorder %s2107_s26, %s1749_s10 }
  0x35   : > { %p1746_p11 = pnand %p1744_p9, %p1730_p10  ;;  %p1752_p13 = scmp.lt.s32.totalorder %s1750_s11, %s1743_s5 }
  0x37   : > { %p1747_p5 = pneg %p1746_p11  ;;  %p1753_p0 = por %p1752_p13, %p1751_p2 }
  0x39   : > { %p1754_p1 = pnand %p1753_p0, %p1747_p5 }
  0x3b   : > { %1757 = shalt.err (!%p1754_p1)
}
  0x3c   : > { %s1983_s13 = smov 256   ;;  %s1984_s14 = smov 16  }
  0x3d   : > { %1521 = dma.hbm_to_vmem [thread:$0]  (!%p2118_p8), %s2112_s27, 8192, %s2107_s26, %s2122_s29, %s1983_s13, %s1983_s13, %s1984_s14  }
  0x3e   : > { %s2151_s6 = sadd.s32 4294967295, %s1980_s25   ;;  %s1272_s4 = sadd.s32 4294967294, %s1980_s25  }
  0x3f   : > { %p79_p2 = scmp.ne.s32.totalorder %s1956_s19, %s1952_s18  ;;  %p2566_p5 = scmp.eq.s32.totalorder %s2151_s6, 0 }
  0x40   : > { %s92_s21 = sadd.s32 1, %s1948_s17  ;;  %p99_p8 = scmp.ne.s32.totalorder %s1948_s17, %s1944_s16 }
  0x41   : > { %s2161_s22 = scalar_select %p90_p6, %s1948_s17, %s92_s21  }
  0x42   : > { %p2165_p10 = por %p2566_p5, %p79_p2  ;;  %p105_p12 = scmp.ne.s32.totalorder %s1944_s16, %s1940_s15 }
  0x43   : > { %2584 = sst [smem:[#allocation25_spill]] %s2161_s22  ;;  %p155_p3 = scmp.eq.s32.totalorder %s2151_s6, 5 }
  0x44   : > { %s2585_s26 = scalar_select %p2165_p10, 1, 0 }
  0x45   : > { %p161_p4 = scmp.eq.s32.totalorder %s1272_s4, 5  ;;  %p1273_p7 = scmp.ge.s32.totalorder %s1980_s25, 1 }
  0x46   : > { %p2177_p9 = por %p105_p12, %p2566_p5  ;;  %p2184_p6 = por %p155_p3, %p99_p8 }
  0x47   : > { %p2188_p11 = por %p161_p4, %p105_p12  ;;  %p168_p13 = scmp.lt.s32.totalorder %s1980_s25, 7 }
  0x48   : > { %s2586_s18 = scalar_select %p2177_p9, 1, 0 }
  0x49   : > { %s2587_s27 = scalar_select %p2184_p6, 1, 0 }
  0x4a   : > { %s2588_s7 = scalar_select %p2188_p11, 1, 0 }
  0x4b   : > { %p2193_p0 = pnand %p1273_p7, %p168_p13  ;;  %s1985_s30 = smov [#allocation3]  }
  0x4c   : > { %s181_s8 = sshll.u32 %s1985_s30, 4  ;;  %p2590_p1 = scmp.eq.s32.totalorder %s1980_s25, 0  ;;  %s182_s8 = int_to_ptr.vmem [resolvable:$true] %s181_s8 }
  0x4d   : > { %s2589_s28 = scalar_select %p2193_p0, 1, 0 }
  0x4e   : > { %p2202_p2 = por %p99_p8, %p2590_p1  ;;  %p1514_p12 = pneg %p2193_p0 }
  0x4f   : > { %s2209_s9 = sand.u32 1, %s1948_s17   ;;  %s1365_s11 = sshll.u32 %s1976_s24, 6 }
  0x50   : > { %s2591_s5 = scalar_select %p2202_p2, 1, 0 }
  0x51   : > { %s1280_s10 = sshll.u32 %s2209_s9, 2  ;;  %p2215_p3 = pnand %p1514_p12, %p2566_p5 }
  0x52   : > { %s2222_s21 = scalar_lea.hbm %s2554_s2, %s1365_s11  ;;  %s220_s30 = scalar_lea.vmem [#allocation8], %s1280_s10 }
  0x53   : > { %s228_s1 = sshll.u32 %s220_s30, 4  ;;  %s1758_s20 = scalar_lea.hbm %s2552_s0, 96  ;;  %s2224_s1 = int_to_ptr.vmem [resolvable:$true] %s228_s1 }
  0x54   : > { %p1759_p8 = scmp.ne.s32.totalorder %s2552_s0, %s1758_s20  ;;  %p1760_p4 = pneg %p2215_p3 }
  0x55   : > { %p1765_p1 = scmp.lt.u32.totalorder %s1758_s20, %s2552_s0 }
  0x56   : > { %p1761_p7 = pnand %p1760_p4, %p1759_p8 }
  0x58   : > { %p1762_p13 = pneg %p1761_p7 }
  0x5a   : > { %p1767_p12 = pnand %p1765_p1, %p1762_p13 }
  0x5c   : > { %1770 = shalt.err (!%p1767_p12)
}
  0x5d   : > { %s1771_s10 = scalar_lea.vmem %s182_s8, 96  ;;  %p1779_p9 = scmp.lt.s32.totalorder %s182_s8, %s182_s8 }
  0x5e   : > { %p1772_p5 = scmp.ne.s32.totalorder %s182_s8, %s1771_s10  ;;  %p1780_p10 = scmp.lt.s32.totalorder %s1771_s10, %s1771_s10 }
  0x60   : > { %p1774_p11 = pnand %p1772_p5, %p1760_p4  ;;  %p1781_p0 = por %p1780_p10, %p1779_p9 }
  0x62   : > { %p1775_p6 = pneg %p1774_p11 }
  0x64   : > { %p1782_p2 = pnand %p1781_p0, %p1775_p6 }
  0x66   : > { %1785 = shalt.err (!%p1782_p2)
}
  0x67   : > { %1517 = dma.hbm_to_vmem [thread:$0]  (!%p2215_p3), %s2552_s0, 96, %s182_s8, [#allocation4]  }
  0x68   : > { %p2593_p5 = scmp.ne.s32.totalorder %s2591_s5, 0  ;;  %p2594_p11 = scmp.lt.s32.totalorder %s1980_s25, 6 }
  0x69   : > { %s1283_s12 = sshll.u32 %s2209_s9, 9  ;;  %s1366_s22 = sshll.u32 %s1976_s24, 13 }
  0x6a   : > { %p2246_p8 = pnand %p2594_p11, %p2593_p5  ;;  %s1786_s11 = scalar_lea.hbm %s2222_s21, 64 }
  0x6b   : > { %p1787_p10 = scmp.ne.s32.totalorder %s2222_s21, %s1786_s11  ;;  %s1791_s5 = scalar_lea.hbm %s2554_s2, 128 }
  0x6c   : > { %p1788_p9 = pneg %p2246_p8  ;;  %p1792_p2 = scmp.lt.u32.totalorder %s2222_s21, %s2554_s2 }
  0x6d   : > { %p1793_p3 = scmp.lt.u32.totalorder %s1791_s5, %s1786_s11  ;;  %p1795_p7 = scmp.lt.u32.totalorder %s1786_s11, %s2222_s21 }
  0x6e   : > { %p1789_p6 = pnand %p1788_p9, %p1787_p10 }
  0x6f   : > { %p1794_p4 = por %p1793_p3, %p1792_p2 }
  0x70   : > { %p1790_p0 = pneg %p1789_p6 }
  0x71   : > { %p1796_p13 = por %p1795_p7, %p1794_p4 }
  0x73   : > { %p1797_p1 = pnand %p1796_p13, %p1790_p0 }
  0x75   : > { %1800 = shalt.err (!%p1797_p1)
}
  0x76   : > { %s1801_s4 = scalar_lea.vmem %s2224_s1, 64  ;;  %s1986_s10 = smov [#allocation8]  }
  0x77   : > { %p1802_p12 = scmp.ne.s32.totalorder %s2224_s1, %s1801_s4  ;;  %s1806_s17 = sshll.u32 %s1986_s10, 4  ;;  %s1807_s17 = int_to_ptr.vmem [resolvable:$false] %s1806_s17 }
  0x78   : > { %s1808_s23 = scalar_lea.vmem %s1807_s17, 128  ;;  %p1809_p10 = scmp.lt.s32.totalorder %s2224_s1, %s1807_s17 }
  0x79   : > { %p1804_p5 = pnand %p1802_p12, %p1788_p9  ;;  %p1810_p6 = scmp.lt.s32.totalorder %s1808_s23, %s1801_s4 }
  0x7b   : > { %p1805_p11 = pneg %p1804_p5  ;;  %p1811_p2 = por %p1810_p6, %p1809_p10 }
  0x7d   : > { %p1812_p3 = pnand %p1811_p2, %p1805_p11 }
  0x7f   : > { %1815 = shalt.err (!%p1812_p3)
}
  0x80   : > { %1524 = dma.hbm_to_vmem [thread:$0]  (!%p2246_p8), %s2222_s21, 64, %s2224_s1, %s2122_s29  }
  0x81   : > { %s2283_s8 = scalar_lea.hbm %s2555_s3, %s1366_s22  ;;  %s239_s5 = scalar_lea.vmem [#allocation9], %s1283_s12 }
  0x82   : > { %s246_s30 = sshll.u32 %s239_s5, 4  ;;  %s236_s14 = scalar_lea.sflag [#allocation10], %s2209_s9  ;;  %s2287_s30 = int_to_ptr.vmem [resolvable:$true] %s246_s30 }
  0x83   : > { %s1816_s4 = scalar_lea.hbm %s2283_s8, 8192  ;;  %s1821_s21 = scalar_lea.hbm %s2555_s3, 16384 }
  0x84   : > { %p1817_p0 = scmp.ne.s32.totalorder %s2283_s8, %s1816_s4  ;;  %p1822_p13 = scmp.lt.u32.totalorder %s2283_s8, %s2555_s3 }
  0x85   : > { %p1823_p1 = scmp.lt.u32.totalorder %s1821_s21, %s1816_s4  ;;  %p1825_p5 = scmp.lt.u32.totalorder %s1816_s4, %s2283_s8 }
  0x86   : > { %p1819_p4 = pnand %p1817_p0, %p1788_p9 }
  0x87   : > { %p1824_p12 = por %p1823_p1, %p1822_p13 }
  0x88   : > { %p1820_p7 = pneg %p1819_p4 }
  0x89   : > { %p1826_p11 = por %p1825_p5, %p1824_p12 }
  0x8b   : > { %p1827_p10 = pnand %p1826_p11, %p1820_p7 }
  0x8d   : > { %1830 = shalt.err (!%p1827_p10)
}
  0x8e   : > { %s1831_s12 = scalar_lea.vmem %s2287_s30, 8192  ;;  %s1987_s17 = smov [#allocation9]  }
  0x8f   : > { %p1832_p6 = scmp.ne.s32.totalorder %s2287_s30, %s1831_s12  ;;  %s1836_s23 = sshll.u32 %s1987_s17, 4  ;;  %s1837_s23 = int_to_ptr.vmem [resolvable:$false] %s1836_s23 }
  0x90   : > { %s1838_s11 = scalar_lea.vmem %s1837_s23, 16384  ;;  %p1839_p0 = scmp.lt.s32.totalorder %s2287_s30, %s1837_s23 }
  0x91   : > { %p1834_p2 = pnand %p1832_p6, %p1788_p9  ;;  %p1840_p4 = scmp.lt.s32.totalorder %s1838_s11, %s1831_s12 }
  0x93   : > { %p1835_p3 = pneg %p1834_p2  ;;  %p1841_p13 = por %p1840_p4, %p1839_p0 }
  0x95   : > { %p1842_p1 = pnand %p1841_p13, %p1835_p3 }
  0x97   : > { %1845 = shalt.err (!%p1842_p1)
}
  0x98   : > { %s1988_s13 = smov 128   ;;  %s1989_s5 = smov 8  }
  0x99   : > { %1527 = dma.hbm_to_vmem [thread:$0]  (!%p2246_p8), %s2283_s8, 8192, %s2287_s30, %s236_s14, %s1988_s13, %s1988_s13, %s1989_s5  }
  0x9a   : > { %p2596_p9 = scmp.ne.s32.totalorder %s2589_s28, 0 }
  0x9b   : > { %p2597_p7 = scmp.eq.s32.totalorder (!%p2596_p9), %s2151_s6, 0 }
  0x9c   : > { %258 = sbr.rel (%p2596_p9) target bundleno = 746 (0x2ea), region = 36 }
  0xa3   : > { %1919 = dma.done.wait (%p2597_p7), [#allocation4], 96   ;;  %p2598_p12 = pmov %p2597_p7 }
  0xa4   : > { %s264_s4 = sand.u32 1, %s2151_s6   ;;  %s266_s1 = sand.u32 1, %s1956_s19  }
  0xa5   : > { %1921 = vsyncadd (%p2598_p12), [#allocation4], 4294967200  ;;  %s1288_s29 = sshll.u32 %s266_s1, 9  ;;  %s265_s21 = scalar_lea.sflag [#allocation7], %s264_s4 }
  0xa6   : > { %s2323_s22 = scalar_lea.vmem [#allocation6], %s1288_s29  ;;  %p2599_p5 = scmp.ne.s32.totalorder %s2585_s26, 0 }
  0xa8   : > { %1923 = dma.done.wait (%p2599_p5), %s265_s21, 8192  }
  0xa9   : > { %1925 = vsyncadd (%p2599_p5), %s265_s21, 4294959104  ;;  %s2330_s28 = sand.u32 1, %s1944_s16   ;;  %p2600_p8 = scmp.ne.s32.totalorder %s2586_s18, 0 }
  0xaa   : > { %s1289_s9 = sshll.u32 %s2330_s28, 2 }
  0xab   : > { %s277_s20 = scalar_lea.vmem [#allocation8], %s1289_s9 }
  0xac   : > { %1927 = dma.done.wait (%p2600_p8), %s265_s21, 64  }
  0xad   : > { %1929 = vsyncadd (%p2600_p8), %s265_s21, 4294967232  ;;  %s1290_s6 = sshll.u32 %s2330_s28, 9  ;;  %s283_s8 = scalar_lea.sflag [#allocation10], %s2330_s28 }
  0xae   : > { %s2339_s30 = scalar_lea.vmem [#allocation9], %s1290_s6 }
  0xaf   : > { %1931 = dma.done.wait (%p2600_p8), %s283_s8, 8192  }
  0xb0   : > { %1933 = vsyncadd (%p2600_p8), %s283_s8, 4294959104  ;;  %s1291_s26 = sshll.u32 %s2330_s28, 1  ;;  %s2601_s10 = sld [smem:[#allocation19_spill]] }
  0xb1   : > { %s2346_s14 = scalar_lea.vmem [#allocation11], %s1291_s26 }
  0xb6   : > { %p1292_p11 = scmp.ne.s32.totalorder %s2601_s10, 0 }
  0xb7   : > { %v328_v0 = vlaneseq (!%p1292_p11)  ;;  %v1990_v1 = vmov (!%p1292_p11), 1983009808   ;;  %v326_v4 = vld [vmem:[%s277_s20] sm:$0xf] (!%p1292_p11) }
  0xb8   : > { %325 = sbr.rel (%p1292_p11) target bundleno = 198 (0xc6), region = 56  ;;  %v347_v2 = vunpack.c.l.s4 (!%p1292_p11), %v1990_v1 }
  0xb9   : > { %v329_v3 = vshrl.u32 (!%p1292_p11), %v328_v0, 7 }
  0xba   : > { %v348_v5 = vunpack.c.0.s8 (!%p1292_p11), %v347_v2 }
  0xbb   : > { %v330_v6 = vsub.s32 (!%p1292_p11), 0, %v329_v3  ;;  %v334_v7 = vsub.s32 (!%p1292_p11), 1, %v329_v3  ;;  %v338_v8 = vsub.s32 (!%p1292_p11), 2, %v329_v3  ;;  %v342_v9 = vsub.s32 (!%p1292_p11), 3, %v329_v3 }
  0xbc   : > { %v351_v10 = vsub.s32 (!%p1292_p11), %v348_v5, %v329_v3 }
  0xbd   : > { %v331_v11 = vrot.slane (!%p1292_p11), %v326_v4, %v330_v6  ;;  %v335_v12 = vrot.slane (!%p1292_p11), %v326_v4, %v334_v7  ;;  %v339_v13 = vrot.slane (!%p1292_p11), %v326_v4, %v338_v8  ;;  %v343_v14 = vrot.slane (!%p1292_p11), %v326_v4, %v342_v9 }
  0xbf   : > { %v344_v15 = vcombine.low %v331_v11, %v335_v12  ;;  %v345_v16 = vcombine.low %v339_v13, %v343_v14 }
  0xc1   : > { %v352_v17 = vrot.slane %v344_v15, %v351_v10  ;;  %v359_v18 = vrot.slane %v345_v16, %v351_v10 }
  0xc3   : > { %v360_v19 = vcombine.low %v352_v17, %v359_v18 }
  0xc5   : > { %362 = vst [vmem:[#allocation2] sm:$0xff] %v360_v19 }
  0xc6 PF: > { %v1632_v20 = vld [vmem:[%s2323_s22 + $0x4] ss:$16 sps:$4 sm:$0xff]   ;;  %v1634_v21 = vld [vmem:[%s2323_s22 + $0xc] ss:$16 sps:$4 sm:$0xff]   ;;  %v1636_v22 = vld [vmem:[%s2323_s22] ss:$16 sps:$4 sm:$0xff]   ;;  %v445_v60 = vlaneseq }
  0xc7   : > { %778 = vmatprep.subr.bf16.mxu0 %v1632_v20  ;;  %v1637_v23 = vld [vmem:[%s2323_s22 + $0x8] ss:$16 sps:$4 sm:$0xff]   ;;  %819 = vmatprep.subr.bf16.mxu1 %v1634_v21  ;;  %v1638_v24 = vld [vmem:[%s2323_s22 + $0x24] ss:$16 sps:$4 sm:$0xff]   ;;  %v1640_v25 = vld [vmem:[%s2323_s22 + $0x2c] ss:$16 sps:$4 sm:$0xff]  }
  0xc8   : > { %779 = vmatpush1.bf16.msra.mxu0 %v1636_v22  ;;  %820 = vmatpush1.bf16.msra.mxu1 %v1637_v23  ;;  %v1642_v26 = vld [vmem:[%s2323_s22 + $0x20] ss:$16 sps:$4 sm:$0xff]   ;;  %v1643_v27 = vld [vmem:[%s2323_s22 + $0x28] ss:$16 sps:$4 sm:$0xff]   ;;  %v1644_v28 = vld [vmem:[%s2323_s22 + $0x44] ss:$16 sps:$4 sm:$0xff]  }
  0xc9   : > { %780 = vmatprep.subr.bf16.mxu0 %v1638_v24  ;;  %821 = vmatprep.subr.bf16.mxu1 %v1640_v25  ;;  %v1646_v29 = vld [vmem:[%s2323_s22 + $0x4c] ss:$16 sps:$4 sm:$0xff]   ;;  %v1648_v30 = vld [vmem:[%s2323_s22 + $0x40] ss:$16 sps:$4 sm:$0xff]   ;;  %v1649_v31 = vld [vmem:[%s2323_s22 + $0x48] ss:$16 sps:$4 sm:$0xff]  }
  0xca   : > { %v1650_v32 = vld [vmem:[%s2323_s22 + $0x64] ss:$16 sps:$4 sm:$0xff]   ;;  %v1652_v33 = vld [vmem:[%s2323_s22 + $0x6c] ss:$16 sps:$4 sm:$0xff]   ;;  %v1654_v34 = vld [vmem:[%s2323_s22 + $0x60] ss:$16 sps:$4 sm:$0xff]  }
  0xcb   : > { %v1655_v35 = vld [vmem:[%s2323_s22 + $0x68] ss:$16 sps:$4 sm:$0xff]   ;;  %v1656_v36 = vld [vmem:[%s2323_s22 + $0x84] ss:$16 sps:$4 sm:$0xff]   ;;  %v1658_v37 = vld [vmem:[%s2323_s22 + $0x8c] ss:$16 sps:$4 sm:$0xff]  }
  0xcc   : > { %781 = vmatpush1.bf16.msra.mxu0 %v1642_v26  ;;  %822 = vmatpush1.bf16.msra.mxu1 %v1643_v27  ;;  %v1660_v38 = vld [vmem:[%s2323_s22 + $0x80] ss:$16 sps:$4 sm:$0xff]   ;;  %v1661_v39 = vld [vmem:[%s2323_s22 + $0x88] ss:$16 sps:$4 sm:$0xff]   ;;  %v1662_v40 = vld [vmem:[%s2323_s22 + $0xa4] ss:$16 sps:$4 sm:$0xff]  }
  0xcd   : > { %782 = vmatprep.subr.bf16.mxu0 %v1644_v28  ;;  %823 = vmatprep.subr.bf16.mxu1 %v1646_v29  ;;  %v1664_v41 = vld [vmem:[%s2323_s22 + $0xac] ss:$16 sps:$4 sm:$0xff]   ;;  %v1666_v42 = vld [vmem:[%s2323_s22 + $0xa0] ss:$16 sps:$4 sm:$0xff]   ;;  %v1667_v43 = vld [vmem:[%s2323_s22 + $0xa8] ss:$16 sps:$4 sm:$0xff]  }
  0xce   : > { %v1668_v44 = vld [vmem:[%s2323_s22 + $0xc4] ss:$16 sps:$4 sm:$0xff]   ;;  %v1670_v45 = vld [vmem:[%s2323_s22 + $0xcc] ss:$16 sps:$4 sm:$0xff]   ;;  %v1672_v46 = vld [vmem:[%s2323_s22 + $0xc0] ss:$16 sps:$4 sm:$0xff]  }
  0xcf   : > { %v1673_v47 = vld [vmem:[%s2323_s22 + $0xc8] ss:$16 sps:$4 sm:$0xff]   ;;  %v1674_v48 = vld [vmem:[%s2323_s22 + $0xe4] ss:$16 sps:$4 sm:$0xff]   ;;  %v1676_v49 = vld [vmem:[%s2323_s22 + $0xec] ss:$16 sps:$4 sm:$0xff]  }
  0xd0   : > { %783 = vmatpush1.bf16.msra.mxu0 %v1648_v30  ;;  %824 = vmatpush1.bf16.msra.mxu1 %v1649_v31  ;;  %v1678_v50 = vld [vmem:[%s2323_s22 + $0xe0] ss:$16 sps:$4 sm:$0xff]   ;;  %s2602_s18 = sld [smem:[#allocation19_spill]]  ;;  %v1679_v51 = vld [vmem:[%s2323_s22 + $0xe8] ss:$16 sps:$4 sm:$0xff]   ;;  %v2392_v2 = vshrl.u32 %v445_v60, 7 }
  0xd1   : > { %784 = vmatprep.subr.bf16.mxu0 %v1650_v32  ;;  %825 = vmatprep.subr.bf16.mxu1 %v1652_v33  ;;  %v1680_v52 = vld [vmem:[%s2323_s22 + $0x104] ss:$16 sps:$4 sm:$0xff]   ;;  %v1682_v53 = vld [vmem:[%s2323_s22 + $0x10c] ss:$16 sps:$4 sm:$0xff]   ;;  %v1684_v54 = vld [vmem:[%s2323_s22 + $0x100] ss:$16 sps:$4 sm:$0xff]  }
  0xd2   : > { %v1685_v55 = vld [vmem:[%s2323_s22 + $0x108] ss:$16 sps:$4 sm:$0xff]   ;;  %v1686_v56 = vld [vmem:[%s2323_s22 + $0x124] ss:$16 sps:$4 sm:$0xff]   ;;  %v1688_v57 = vld [vmem:[%s2323_s22 + $0x12c] ss:$16 sps:$4 sm:$0xff]  }
  0xd3   : > { %v1991_v58 = vmov 1966171168   ;;  %v1690_v61 = vld [vmem:[%s2323_s22 + $0x120] ss:$16 sps:$4 sm:$0xff]   ;;  %v1691_v62 = vld [vmem:[%s2323_s22 + $0x128] ss:$16 sps:$4 sm:$0xff]  }
  0xd4   : > { %785 = vmatpush1.bf16.msra.mxu0 %v1654_v34  ;;  %826 = vmatpush1.bf16.msra.mxu1 %v1655_v35  ;;  %v443_v59 = vunpack.c.l.s4 %v1991_v58  ;;  %v1692_v63 = vld [vmem:[%s2323_s22 + $0x144] ss:$16 sps:$4 sm:$0xff]   ;;  %v1694_v0 = vld [vmem:[%s2323_s22 + $0x14c] ss:$16 sps:$4 sm:$0xff]   ;;  %v1696_v3 = vld [vmem:[%s2323_s22 + $0x140] ss:$16 sps:$4 sm:$0xff]  }
  0xd5   : > { %786 = vmatprep.subr.bf16.mxu0 %v1656_v36  ;;  %827 = vmatprep.subr.bf16.mxu1 %v1658_v37  ;;  %v1697_v4 = vld [vmem:[%s2323_s22 + $0x148] ss:$16 sps:$4 sm:$0xff]   ;;  %v1698_v5 = vld [vmem:[%s2323_s22 + $0x164] ss:$16 sps:$4 sm:$0xff]   ;;  %v1700_v6 = vld [vmem:[%s2323_s22 + $0x16c] ss:$16 sps:$4 sm:$0xff]  }
  0xd6   : > { %s1293_s12 = sshll.u32 %s2602_s18, 8  ;;  %v444_v1 = vunpack.c.0.s8 %v443_v59  ;;  %v1702_v9 = vld [vmem:[%s2323_s22 + $0x160] ss:$16 sps:$4 sm:$0xff]   ;;  %v1703_v10 = vld [vmem:[%s2323_s22 + $0x168] ss:$16 sps:$4 sm:$0xff]   ;;  %p1359_p10 = scmp.ne.s32.totalorder %s2602_s18, 2 }
  0xd7   : > { %s365_s17 = sshra.s32 %s1293_s12, 7  ;;  %v1704_v12 = vld [vmem:[%s2323_s22 + $0x184] ss:$16 sps:$4 sm:$0xff]   ;;  %v1706_v13 = vld [vmem:[%s2323_s22 + $0x18c] ss:$16 sps:$4 sm:$0xff]  }
  0xd8   : > { %787 = vmatpush1.bf16.msra.mxu0 %v1660_v38  ;;  %828 = vmatpush1.bf16.msra.mxu1 %v1661_v39  ;;  %v447_v7 = vsub.s32 %v444_v1, %v2392_v2  ;;  %s367_s23 = scalar_lea.vmem [#allocation3], %s365_s17  ;;  %v1708_v15 = vld [vmem:[%s2323_s22 + $0x180] ss:$16 sps:$4 sm:$0xff]   ;;  %v1709_v16 = vld [vmem:[%s2323_s22 + $0x188] ss:$16 sps:$4 sm:$0xff]  }
  0xd9   : > { %788 = vmatprep.subr.bf16.mxu0 %v1662_v40  ;;  %829 = vmatprep.subr.bf16.mxu1 %v1664_v41  ;;  %v1294_v8 = vld.sshfl [vmem:[%s367_s23] sm:$0x11 pattern:$0x75316420]  ;;  %v1710_v17 = vld [vmem:[%s2323_s22 + $0x1a4] ss:$16 sps:$4 sm:$0xff]  }
  0xda   : > { %v441_v11 = vcombine.high %v1294_v8, %v1294_v8  ;;  %v1712_v18 = vld [vmem:[%s2323_s22 + $0x1ac] ss:$16 sps:$4 sm:$0xff]   ;;  %v1714_v19 = vld [vmem:[%s2323_s22 + $0x1a0] ss:$16 sps:$4 sm:$0xff]   ;;  %v1715_v20 = vld [vmem:[%s2323_s22 + $0x1a8] ss:$16 sps:$4 sm:$0xff]   ;;  %v448_v29 = vrot.slane %v1294_v8, %v447_v7 }
  0xdb   : > { %v1716_v21 = vld [vmem:[%s2323_s22 + $0x1c4] ss:$16 sps:$4 sm:$0xff]   ;;  %v1718_v22 = vld [vmem:[%s2323_s22 + $0x1cc] ss:$16 sps:$4 sm:$0xff]   ;;  %v1720_v23 = vld [vmem:[%s2323_s22 + $0x1c0] ss:$16 sps:$4 sm:$0xff]  }
  0xdc   : > { %789 = vmatpush1.bf16.msra.mxu0 %v1666_v42  ;;  %830 = vmatpush1.bf16.msra.mxu1 %v1667_v43  ;;  %v455_v14 = vrot.slane %v441_v11, %v447_v7  ;;  %v1721_v24 = vld [vmem:[%s2323_s22 + $0x1c8] ss:$16 sps:$4 sm:$0xff]   ;;  %v1722_v25 = vld [vmem:[%s2323_s22 + $0x1e4] ss:$16 sps:$4 sm:$0xff]   ;;  %v1724_v26 = vld [vmem:[%s2323_s22 + $0x1ec] ss:$16 sps:$4 sm:$0xff]  }
  0xdd   : > { %790 = vmatprep.subr.bf16.mxu0 %v1668_v44  ;;  %831 = vmatprep.subr.bf16.mxu1 %v1670_v45  ;;  %v1726_v27 = vld [vmem:[%s2323_s22 + $0x1e0] ss:$16 sps:$4 sm:$0xff]   ;;  %v1727_v28 = vld [vmem:[%s2323_s22 + $0x1e8] ss:$16 sps:$4 sm:$0xff]   ;;  %v1992_v30 = vmov 1983009808  }
  0xde   : > { %810 = vmatprep.mubr.bf16.mxu0 %v455_v14  ;;  %851 = vmatprep.mubr.bf16.mxu1 %v455_v14  ;;  %v867_v31 = vunpack.c.l.s4 %v1992_v30  ;;  %v922_v58 = vld [vmem:[%s2339_s30 + $0x100] sm:$0xff] (!%p1359_p10)  ;;  %v923_v59 = vld [vmem:[%s2339_s30 + $0x108] sm:$0xff] (!%p1359_p10)  ;;  %v908_v60 = vld [vmem:[%s2339_s30 + $0x90] sm:$0xff] (!%p1359_p10) }
  0xdf   : > { %v925_v7 = vld [vmem:[%s2339_s30 + $0x118] sm:$0xff] (!%p1359_p10)  ;;  %v910_v8 = vld [vmem:[%s2339_s30 + $0xa0] sm:$0xff] (!%p1359_p10) }
  0xe0   : > { %791 = vmatpush1.bf16.msra.mxu0 %v1672_v46  ;;  %832 = vmatpush1.bf16.msra.mxu1 %v1673_v47  ;;  %v868_v32 = vunpack.c.0.s8 %v867_v31  ;;  %v364_v46 = vld [vmem:[#allocation2] sm:$0xff]  ;;  %v894_v14 = vld [vmem:[%s2339_s30 + $0x20] sm:$0xff] (!%p1359_p10)  ;;  %v929_v30 = vld [vmem:[%s2339_s30 + $0x138] sm:$0xff] (!%p1359_p10) }
  0xe1   : > { %792 = vmatprep.subr.bf16.mxu0 %v1674_v48  ;;  %833 = vmatprep.subr.bf16.mxu1 %v1676_v49  ;;  %v906_v49 = vld [vmem:[%s2339_s30 + $0x80] sm:$0xff] (!%p1359_p10) }
  0xe2   : > { %v2418_v35 = vsub.s32 %v868_v32, %v2392_v2  ;;  %v914_v31 = vld [vmem:[%s2339_s30 + $0xc0] sm:$0xff] (!%p1359_p10)  ;;  %v915_v32 = vld [vmem:[%s2339_s30 + $0xc8] sm:$0xff] (!%p1359_p10) }
  0xe4   : > { %793 = vmatpush1.bf16.msra.mxu0 %v1678_v50  ;;  %834 = vmatpush1.bf16.msra.mxu1 %v1679_v51  ;;  %v907_v50 = vld [vmem:[%s2339_s30 + $0x88] sm:$0xff] (!%p1359_p10)  ;;  %v938_v51 = vld [vmem:[%s2339_s30 + $0x180] sm:$0xff] (!%p1359_p10) }
  0xe5   : > { %794 = vmatprep.subr.bf16.mxu0 %v1680_v52  ;;  %835 = vmatprep.subr.bf16.mxu1 %v1682_v53  ;;  %v1437_v52 = vpack.c.bf16 (!%p1359_p10), %v907_v50, %v906_v49  ;;  %v939_v53 = vld [vmem:[%s2339_s30 + $0x188] sm:$0xff] (!%p1359_p10) }
  0xe8   : > { %795 = vmatpush1.bf16.msra.mxu0 %v1684_v54  ;;  %836 = vmatpush1.bf16.msra.mxu1 %v1685_v55  ;;  %v890_v54 = vld [vmem:[%s2339_s30] sm:$0xff] (!%p1359_p10)  ;;  %v891_v55 = vld [vmem:[%s2339_s30 + $0x8] sm:$0xff] (!%p1359_p10) }
  0xe9   : > { %796 = vmatprep.subr.bf16.mxu0 %v1686_v56  ;;  %837 = vmatprep.subr.bf16.mxu1 %v1688_v57  ;;  %v1469_v56 = vpack.c.bf16 (!%p1359_p10), %v939_v53, %v938_v51  ;;  %v1439_v57 = vpack.c.bf16 (!%p1359_p10), %v891_v55, %v890_v54  ;;  %v900_v51 = vld [vmem:[%s2339_s30 + $0x50] sm:$0xff] (!%p1359_p10)  ;;  %v933_v55 = vld [vmem:[%s2339_s30 + $0x158] sm:$0xff] (!%p1359_p10) }
  0xea   : > { %v932_v53 = vld [vmem:[%s2339_s30 + $0x150] sm:$0xff] (!%p1359_p10) }
  0xec   : > { %797 = vmatpush1.bf16.msra.mxu0 %v1690_v61  ;;  %838 = vmatpush1.bf16.msra.mxu1 %v1691_v62  ;;  %v1471_v61 = vpack.c.bf16 (!%p1359_p10), %v923_v59, %v922_v58  ;;  %v909_v62 = vld [vmem:[%s2339_s30 + $0x98] sm:$0xff] (!%p1359_p10)  ;;  %v950_v58 = vld [vmem:[%s2339_s30 + $0x1e0] sm:$0xff] (!%p1359_p10)  ;;  %v951_v59 = vld [vmem:[%s2339_s30 + $0x1e8] sm:$0xff] (!%p1359_p10) }
  0xed   : > { %798 = vmatprep.subr.bf16.mxu0 %v1692_v63  ;;  %839 = vmatprep.subr.bf16.mxu1 %v1694_v0  ;;  %v940_v63 = vld [vmem:[%s2339_s30 + $0x190] sm:$0xff] (!%p1359_p10)  ;;  %v941_v0 = vld [vmem:[%s2339_s30 + $0x198] sm:$0xff] (!%p1359_p10)  ;;  %v1441_v1 = vpack.c.bf16 (!%p1359_p10), %v909_v62, %v908_v60  ;;  %v1491_v62 = vpack.c.bf16 (!%p1359_p10), %v933_v55, %v932_v53 }
  0xee   : > { %v1473_v2 = vpack.c.bf16 (!%p1359_p10), %v941_v0, %v940_v63  ;;  %v903_v0 = vld [vmem:[%s2339_s30 + $0x68] sm:$0xff] (!%p1359_p10) }
  0xf0   : > { %799 = vmatpush1.bf16.msra.mxu0 %v1696_v3  ;;  %840 = vmatpush1.bf16.msra.mxu1 %v1697_v4  ;;  %v892_v3 = vld [vmem:[%s2339_s30 + $0x10] sm:$0xff] (!%p1359_p10)  ;;  %v893_v4 = vld [vmem:[%s2339_s30 + $0x18] sm:$0xff] (!%p1359_p10) }
  0xf1   : > { %800 = vmatprep.subr.bf16.mxu0 %v1698_v5  ;;  %841 = vmatprep.subr.bf16.mxu1 %v1700_v6  ;;  %v924_v5 = vld [vmem:[%s2339_s30 + $0x110] sm:$0xff] (!%p1359_p10)  ;;  %v1443_v6 = vpack.c.bf16 (!%p1359_p10), %v893_v4, %v892_v3  ;;  %v1493_v3 = vpack.c.bf16 (!%p1359_p10), %v951_v59, %v950_v58  ;;  %v935_v4 = vld [vmem:[%s2339_s30 + $0x168] sm:$0xff] (!%p1359_p10) }
  0xf4   : > { %801 = vmatpush1.bf16.msra.mxu0 %v1702_v9  ;;  %842 = vmatpush1.bf16.msra.mxu1 %v1703_v10  ;;  %v911_v9 = vld [vmem:[%s2339_s30 + $0xa8] sm:$0xff] (!%p1359_p10)  ;;  %v1475_v10 = vpack.c.bf16 (!%p1359_p10), %v925_v7, %v924_v5  ;;  %v920_v5 = vld [vmem:[%s2339_s30 + $0xf0] sm:$0xff] (!%p1359_p10) }
  0xf5   : > { %802 = vmatprep.subr.bf16.mxu0 %v1704_v12  ;;  %843 = vmatprep.subr.bf16.mxu1 %v1706_v13  ;;  %v1445_v11 = vpack.c.bf16 (!%p1359_p10), %v911_v9, %v910_v8  ;;  %v942_v12 = vld [vmem:[%s2339_s30 + $0x1a0] sm:$0xff] (!%p1359_p10)  ;;  %v943_v13 = vld [vmem:[%s2339_s30 + $0x1a8] sm:$0xff] (!%p1359_p10)  ;;  %v952_v8 = vld [vmem:[%s2339_s30 + $0x1f0] sm:$0xff] (!%p1359_p10) }
  0xf6   : > { %v953_v9 = vld [vmem:[%s2339_s30 + $0x1f8] sm:$0xff] (!%p1359_p10) }
  0xf8   : > { %803 = vmatpush1.bf16.msra.mxu0 %v1708_v15  ;;  %844 = vmatpush1.bf16.msra.mxu1 %v1709_v16  ;;  %v1477_v15 = vpack.c.bf16 (!%p1359_p10), %v943_v13, %v942_v12  ;;  %v895_v16 = vld [vmem:[%s2339_s30 + $0x28] sm:$0xff] (!%p1359_p10) }
  0xf9   : > { %804 = vmatprep.subr.bf16.mxu0 %v1710_v17  ;;  %845 = vmatprep.subr.bf16.mxu1 %v1712_v18  ;;  %v926_v17 = vld [vmem:[%s2339_s30 + $0x120] sm:$0xff] (!%p1359_p10)  ;;  %v927_v18 = vld [vmem:[%s2339_s30 + $0x128] sm:$0xff] (!%p1359_p10) }
  0xfc   : > { %805 = vmatpush1.bf16.msra.mxu0 %v1714_v19  ;;  %846 = vmatpush1.bf16.msra.mxu1 %v1715_v20  ;;  %v1447_v19 = vpack.c.bf16 (!%p1359_p10), %v895_v16, %v894_v14  ;;  %v912_v20 = vld [vmem:[%s2339_s30 + $0xb0] sm:$0xff] (!%p1359_p10)  ;;  %v905_v16 = vld [vmem:[%s2339_s30 + $0x78] sm:$0xff] (!%p1359_p10) }
  0xfd   : > { %806 = vmatprep.subr.bf16.mxu0 %v1716_v21  ;;  %847 = vmatprep.subr.bf16.mxu1 %v1718_v22  ;;  %v913_v21 = vld [vmem:[%s2339_s30 + $0xb8] sm:$0xff] (!%p1359_p10)  ;;  %v944_v22 = vld [vmem:[%s2339_s30 + $0x1b0] sm:$0xff] (!%p1359_p10) }
 0x100   : > { %807 = vmatpush1.bf16.msra.mxu0 %v1720_v23  ;;  %848 = vmatpush1.bf16.msra.mxu1 %v1721_v24  ;;  %v1479_v23 = vpack.c.bf16 (!%p1359_p10), %v927_v18, %v926_v17  ;;  %v1449_v24 = vpack.c.bf16 (!%p1359_p10), %v913_v21, %v912_v20  ;;  %v1497_v17 = vpack.c.bf16 (!%p1359_p10), %v953_v9, %v952_v8  ;;  %v936_v18 = vld [vmem:[%s2339_s30 + $0x170] sm:$0xff] (!%p1359_p10) }
 0x101   : > { %808 = vmatprep.subr.bf16.mxu0 %v1722_v25  ;;  %849 = vmatprep.subr.bf16.mxu1 %v1724_v26  ;;  %v945_v25 = vld [vmem:[%s2339_s30 + $0x1b8] sm:$0xff] (!%p1359_p10)  ;;  %v896_v26 = vld [vmem:[%s2339_s30 + $0x30] sm:$0xff] (!%p1359_p10) }
 0x104   : > { %809 = vmatpush1.bf16.msra.mxu0 %v1726_v27  ;;  %850 = vmatpush1.bf16.msra.mxu1 %v1727_v28  ;;  %v897_v27 = vld [vmem:[%s2339_s30 + $0x38] sm:$0xff] (!%p1359_p10)  ;;  %v1481_v28 = vpack.c.bf16 (!%p1359_p10), %v945_v25, %v944_v22 }
 0x105   : > { %1438 = vmatprep.subr.bf16.mxu0 (!%p1359_p10), %v1437_v52  ;;  %1470 = vmatprep.subr.bf16.mxu1 (!%p1359_p10), %v1469_v56  ;;  %v901_v52 = vld [vmem:[%s2339_s30 + $0x58] sm:$0xff] (!%p1359_p10)  ;;  %v918_v56 = vld [vmem:[%s2339_s30 + $0xe0] sm:$0xff] (!%p1359_p10) }
 0x106   : > { %v1459_v60 = vpack.c.bf16 (!%p1359_p10), %v901_v52, %v900_v51 }
 0x107   : > { %811 = vmatmul.mubr.bf16.vlgmr.msra.gmra.mrb[0].mxu0 %v448_v29  ;;  %852 = vmatmul.mubr.bf16.vlgmr.msra.gmra.mrb[0].mxu1 %v448_v29  ;;  %v928_v29 = vld [vmem:[%s2339_s30 + $0x130] sm:$0xff] (!%p1359_p10) }
 0x108   : > { %1440 = vmatpush3.bf16.msra.mxu0 (!%p1359_p10), %v1439_v57  ;;  %1472 = vmatpush3.bf16.msra.mxu1 (!%p1359_p10), %v1471_v61  ;;  %v919_v57 = vld [vmem:[%s2339_s30 + $0xe8] sm:$0xff] (!%p1359_p10)  ;;  %v902_v61 = vld [vmem:[%s2339_s30 + $0x60] sm:$0xff] (!%p1359_p10) }
 0x109   : > { %1442 = vmatprep.subr.bf16.mxu0 (!%p1359_p10), %v1441_v1  ;;  %1474 = vmatprep.subr.bf16.mxu1 (!%p1359_p10), %v1473_v2  ;;  %v1461_v63 = vpack.c.bf16 (!%p1359_p10), %v919_v57, %v918_v56  ;;  %v934_v1 = vld [vmem:[%s2339_s30 + $0x160] sm:$0xff] (!%p1359_p10) }
 0x10a   : > { %v1495_v13 = vpack.c.bf16 (!%p1359_p10), %v935_v4, %v934_v1 }
 0x10c   : > { %1444 = vmatpush3.bf16.msra.mxu0 (!%p1359_p10), %v1443_v6  ;;  %1476 = vmatpush3.bf16.msra.mxu1 (!%p1359_p10), %v1475_v10  ;;  %v921_v6 = vld [vmem:[%s2339_s30 + $0xf8] sm:$0xff] (!%p1359_p10)  ;;  %v1463_v10 = vpack.c.bf16 (!%p1359_p10), %v903_v0, %v902_v61 }
 0x10d   : > { %1446 = vmatprep.subr.bf16.mxu0 (!%p1359_p10), %v1445_v11  ;;  %1478 = vmatprep.subr.bf16.mxu1 (!%p1359_p10), %v1477_v15  ;;  %v1465_v14 = vpack.c.bf16 (!%p1359_p10), %v921_v6, %v920_v5  ;;  %v904_v15 = vld [vmem:[%s2339_s30 + $0x70] sm:$0xff] (!%p1359_p10) }
 0x10e   : > { %v1467_v22 = vpack.c.bf16 (!%p1359_p10), %v905_v16, %v904_v15 }
 0x110   : > { %1448 = vmatpush3.bf16.msra.mxu0 (!%p1359_p10), %v1447_v19  ;;  %1480 = vmatpush3.bf16.msra.mxu1 (!%p1359_p10), %v1479_v23  ;;  %v937_v19 = vld [vmem:[%s2339_s30 + $0x178] sm:$0xff] (!%p1359_p10) }
 0x111   : > { %1450 = vmatprep.subr.bf16.mxu0 (!%p1359_p10), %v1449_v24  ;;  %1482 = vmatprep.subr.bf16.mxu1 (!%p1359_p10), %v1481_v28  ;;  %v1499_v24 = vpack.c.bf16 (!%p1359_p10), %v937_v19, %v936_v18 }
 0x1da   : > { %v812_v33 = vpop.f32.mrb[0].mxu0  ;;  %v853_v34 = vpop.f32.mrb[0].mxu1 }
 0x1db   : > { %v814_v36 = vpop.f32.mrb[1].mxu0  ;;  %v855_v37 = vpop.f32.mrb[1].mxu1 }
 0x1dc   : > { %v864_v38 = vcombine.low %v812_v33, %v814_v36  ;;  %v865_v39 = vcombine.low %v853_v34, %v855_v37  ;;  %v816_v40 = vpop.f32.mrb[2].mxu0  ;;  %v857_v41 = vpop.f32.mrb[2].mxu1  ;;  %v946_v33 = vld [vmem:[%s2339_s30 + $0x1c0] sm:$0xff] (!%p1359_p10)  ;;  %v947_v34 = vld [vmem:[%s2339_s30 + $0x1c8] sm:$0xff] (!%p1359_p10)  ;;  %v1451_v36 = vpack.c.bf16 (!%p1359_p10), %v897_v27, %v896_v26  ;;  %v1483_v37 = vpack.c.bf16 (!%p1359_p10), %v929_v30, %v928_v29 }
 0x1dd   : > { %v817_v42 = vpop.f32.mrb[3].mxu0  ;;  %v858_v43 = vpop.f32.mrb[3].mxu1  ;;  %v899_v40 = vld [vmem:[%s2339_s30 + $0x48] sm:$0xff] (!%p1359_p10)  ;;  %v930_v41 = vld [vmem:[%s2339_s30 + $0x140] sm:$0xff] (!%p1359_p10) }
 0x1de   : > { %v872_v44 = vrot.slane %v864_v38, %v2418_v35  ;;  %v879_v45 = vrot.slane %v865_v39, %v2418_v35  ;;  %887 = sbr.rel (%p1359_p10) target bundleno = 719 (0x2cf), region = 60  ;;  %v1453_v38 = vpack.c.bf16 (!%p1359_p10), %v915_v32, %v914_v31  ;;  %v898_v39 = vld [vmem:[%s2339_s30 + $0x40] sm:$0xff] (!%p1359_p10)  ;;  %v1485_v42 = vpack.c.bf16 (!%p1359_p10), %v947_v34, %v946_v33  ;;  %v931_v43 = vld [vmem:[%s2339_s30 + $0x148] sm:$0xff] (!%p1359_p10)  ;;  %1452 = vmatpush3.bf16.msra.mxu0 (!%p1359_p10), %v1451_v36 }
 0x1df   : > { %1484 = vmatpush3.bf16.msra.mxu1 (!%p1359_p10), %v1483_v37  ;;  %v1487_v49 = vpack.c.bf16 (!%p1359_p10), %v931_v43, %v930_v41 }
 0x1e0   : > { %v880_v47 = vcombine.low %v872_v44, %v879_v45  ;;  %v916_v44 = vld [vmem:[%s2339_s30 + $0xd0] sm:$0xff] (!%p1359_p10)  ;;  %v917_v45 = vld [vmem:[%s2339_s30 + $0xd8] sm:$0xff] (!%p1359_p10)  ;;  %1454 = vmatprep.subr.bf16.mxu0 (!%p1359_p10), %v1453_v38  ;;  %1486 = vmatprep.subr.bf16.mxu1 (!%p1359_p10), %v1485_v42 }
 0x1e1   : > { %v1457_v50 = vpack.c.bf16 (!%p1359_p10), %v917_v45, %v916_v44 }
 0x1e2   : > { %v882_v48 = vadd.f32 %v880_v47, %v364_v46  ;;  %v948_v46 = vld [vmem:[%s2339_s30 + $0x1d0] sm:$0xff] (!%p1359_p10)  ;;  %v949_v47 = vld [vmem:[%s2339_s30 + $0x1d8] sm:$0xff] (!%p1359_p10) }
 0x1e3   : > { %v1489_v54 = vpack.c.bf16 (!%p1359_p10), %v949_v47, %v948_v46  ;;  %1488 = vmatpush3.bf16.msra.mxu1 (!%p1359_p10), %v1487_v49 }
 0x1e4   : > { %883 = vst [vmem:[#allocation2] sm:$0xff] %v882_v48  ;;  %v1455_v48 = vpack.c.bf16 (!%p1359_p10), %v899_v40, %v898_v39 }
 0x1e5   : > { %1490 = vmatprep.subr.bf16.mxu1 %v1489_v54 }
 0x1e6   : > { %1456 = vmatpush3.bf16.msra.mxu0 %v1455_v48 }
 0x1e7   : > { %1458 = vmatprep.subr.bf16.mxu0 %v1457_v50  ;;  %1492 = vmatpush3.bf16.msra.mxu1 %v1491_v62 }
 0x1e8   : > { %1494 = vmatprep.subr.bf16.mxu1 %v1493_v3 }
 0x1ea   : > { %1460 = vmatpush3.bf16.msra.mxu0 %v1459_v60 }
 0x1eb   : > { %v888_v2 = vld [vmem:[#allocation2] sm:$0xff]  ;;  %1462 = vmatprep.subr.bf16.mxu0 %v1461_v63  ;;  %1496 = vmatpush3.bf16.msra.mxu1 %v1495_v13 }
 0x1ec   : > { %v889_v7 = vmax.f32 %v888_v2, 0.0  ;;  %1498 = vmatprep.subr.bf16.mxu1 %v1497_v17 }
 0x1ee   : > { %v962_v11 = vrot.slane %v889_v7, %v2418_v35  ;;  %v955_v12 = vcombine.high %v889_v7, %v889_v7  ;;  %1464 = vmatpush3.bf16.msra.mxu0 %v1463_v10 }
 0x1ef   : > { %1466 = vmatprep.subr.bf16.mxu0 %v1465_v14  ;;  %1500 = vmatpush3.bf16.msra.mxu1 %v1499_v24 }
 0x1f0   : > { %v970_v20 = vcombine.high %v962_v11, %v962_v11  ;;  %v969_v21 = vrot.slane %v955_v12, %v2418_v35 }
 0x1f2   : > { %1040 = vmatprep.mubr.f32.mxu0 %v970_v20  ;;  %v971_v23 = vcombine.high %v969_v21, %v969_v21  ;;  %1468 = vmatpush3.bf16.msra.mxu0 %v1467_v22 }
 0x1f4   : > { %1110 = vmatprep.mubr.f32.mxu1 %v971_v23 }
 0x1f5   : > { %1041 = vmatmul.mubr.f32.vlgmr.msra.gmra.mrb[0].mxu0 %v962_v11  ;;  %1111 = vmatmul.mubr.f32.vlgmr.msra.gmra.mrb[0].mxu1 %v969_v21 }
 0x2c8   : > { %v1399_v25 = vpop.f32.mrb[0].mxu0  ;;  %v1434_v26 = vpop.f32.mrb[0].mxu1 }
 0x2c9   : > { %v1400_v27 = vpop.f32.mrb[1].mxu0  ;;  %v1435_v29 = vpop.f32.mrb[1].mxu1 }
 0x2ca   : > { %v1401_v28 = vadd.f32 %v1400_v27, %v1399_v25  ;;  %v1436_v35 = vadd.f32 %v1435_v29, %v1434_v26 }
 0x2cc   : > { %v1113_v30 = vadd.f32 %v1436_v35, %v1401_v28 }
 0x2ce   : > { %1116 = vst [vmem:[%s2346_s14] sm:$0x3] %v1113_v30 }
 0x2cf PF: > { %s2603_s11 = sld [smem:[#allocation20_spill]]  ;;  %s2604_s1 = sld [smem:[#allocation27_spill]] }
 0x2d0   : > { %s1131_s21 = sshll.u32 %s2346_s14, 4  ;;  %s1118_s22 = scalar_lea.sflag [#allocation5], %s2330_s28  ;;  %s1132_s21 = int_to_ptr.vmem [resolvable:$true] %s1131_s21 }
 0x2d1   : > { %s1846_s9 = scalar_lea.vmem %s1132_s21, 32  ;;  %p2605_p2 = scmp.ne.s32.totalorder %s2587_s27, 0 }
 0x2d2   : > { %p1847_p6 = scmp.ne.s32.totalorder %s1132_s21, %s1846_s9  ;;  %s1993_s20 = smov [#allocation11]  }
 0x2d3   : > { %s1850_s6 = sshll.u32 %s1993_s20, 4  ;;  %s1851_s6 = int_to_ptr.vmem [resolvable:$false] %s1850_s6 }
 0x2d4   : > { %p1848_p3 = pnand %p1847_p6, %p2605_p2  ;;  %s1852_s8 = scalar_lea.vmem %s1851_s6, 64 }
 0x2d5   : > { %s1361_s13 = sshll.u32 %s2603_s11, 5  ;;  %p1853_p4 = scmp.lt.s32.totalorder %s1132_s21, %s1851_s6 }
 0x2d6   : > { %s2494_s29 = scalar_lea.hbm %s2604_s1, %s1361_s13  ;;  %p1849_p0 = pneg %p1848_p3 }
 0x2d7   : > { %p1854_p13 = scmp.lt.s32.totalorder %s1852_s8, %s1846_s9 }
 0x2d9   : > { %p1855_p1 = por %p1854_p13, %p1853_p4 }
 0x2db   : > { %p1856_p9 = pnand %p1855_p1, %p1849_p0 }
 0x2dd   : > { %1859 = shalt.err (!%p1856_p9)
}
 0x2de   : > { %s1860_s28 = scalar_lea.hbm %s2494_s29, 32  ;;  %s1864_s14 = scalar_lea.hbm %s2604_s1, 64 }
 0x2df   : > { %p1861_p7 = scmp.ne.s32.totalorder %s2494_s29, %s1860_s28  ;;  %p1865_p8 = scmp.lt.u32.totalorder %s2494_s29, %s2604_s1 }
 0x2e0   : > { %p1866_p11 = scmp.lt.u32.totalorder %s1864_s14, %s1860_s28  ;;  %p1868_p6 = scmp.lt.u32.totalorder %s1860_s28, %s2494_s29 }
 0x2e1   : > { %p1862_p12 = pnand %p1861_p7, %p2605_p2 }
 0x2e2   : > { %p1867_p10 = por %p1866_p11, %p1865_p8 }
 0x2e3   : > { %p1863_p5 = pneg %p1862_p12 }
 0x2e4   : > { %p1869_p3 = por %p1868_p6, %p1867_p10 }
 0x2e6   : > { %p1870_p0 = pnand %p1869_p3, %p1863_p5 }
 0x2e8   : > { %1873 = shalt.err (!%p1870_p0)
}
 0x2e9   : > { %1512 = dma.vmem_to_hbm [thread:$0]  (%p2605_p2), %s1132_s21, 32, %s2494_s29, %s1118_s22  }
 0x2ea PF: > { %p1535_p4 = scmp.ge.s32.totalorder %s1980_s25, 2  ;;  %s1143_s12 = sand.u32 1, %s1940_s15  }
 0x2eb   : > { %p2606_p13 = scmp.ne.s32.totalorder %s2588_s7, 0  ;;  %s1144_s17 = scalar_lea.sflag [#allocation5], %s1143_s12 }
 0x2ed   : > { %p1529_p1 = pnand %p1535_p4, %p2606_p13 }
 0x2ef   : > { %1935 = dma.done.wait (!%p1529_p1), %s1144_s17, 32  }
 0x2f0   : > { %1937 = vsyncadd (!%p1529_p1), %s1144_s17, 4294967264  ;;  %s24_s25 = sadd.s32 1, %s1980_s25   ;;  %s2607_s23 = sld [smem:[#allocation17_spill]] }
 0x2f1   : > { %p21_p9 = scmp.ge.s32.totalorder %s24_s25, 8   ;;  %s2608_s17 = sld [smem:[#allocation25_spill]] }
 0x2f2   : > { %s2609_s27 = sld [smem:[#allocation18_spill]]  ;;  %s2610_s20 = sld [smem:[#allocation24_spill]] }
 0x2f3   : > { %s2611_s21 = sld [smem:[#allocation21_spill]]  ;;  %s2612_s11 = sld [smem:[#allocation22_spill]] }
 0x2f4   : > { %s2613_s13 = sld [smem:[#allocation23_spill]]  ;;  %s2614_s15 = smov %s1944_s16 }
 0x2f5   : > { %s2616_s18 = smov %s1956_s19  ;;  %s2618_s22 = smov %s1976_s24 }
 0x2f6   : > { %s2615_s16 = smov %s2607_s23  ;;  %23 = sbr.rel (!%p21_p9) target bundleno = 15 (0xf), region = 119 }
 0x2f8   : > { %s2617_s19 = smov %s2609_s27 }
 0x2f9   : > { %s2619_s23 = smov %s2612_s11 }
 0x2fa   : > { %s2620_s24 = smov %s2613_s13 }
 0x2fd   :  { %1149 = vsyncpa [#allocation4], 1 }
 0x2fe   :  { %1151 = vsyncpa [#allocation4 + $0x1], 1 }
 0x2ff   :  { %1152 = vsyncpa [#allocation7], 1 }
 0x300   :  { %1154 = vsyncpa [#allocation7 + $0x1], 1 }
 0x301   :  { %1155 = vsyncpa [#allocation10], 1 }
 0x302   :  { %1157 = vsyncpa [#allocation10 + $0x1], 1 }
 0x303   :  { %1158 = vsyncpa [#allocation5], 1 }
 0x304   :  { %1160 = vsyncpa [#allocation5 + $0x1], 1 }

</bundles_post_ra>
